<compile_context>
chip_gen: v5e
topology: v5e:2x2
jax: 0.10.0
libtpu: 0.0.40
codegen_flags: <defaults>
</compile_context>

<pallas_src>
import math

import jax
import jax.numpy as jnp
from jax.experimental import pallas as pl
from jax.experimental.pallas import tpu as pltpu

_SN_EPS = 1e-12          # torch _SpectralNorm default eps
_ALPHA = 0.05            # _SNReweight default alpha
_INIT_EPS = 1e-5         # _EPS in the reference module (init clamp only)
_LANES = 128
# Each (E, n) part must fit comfortably in VMEM (f32 bytes) for the fused path.
_FUSED_PART_F32_BYTES_MAX = 4 * 1024 * 1024


def _sublane_mult(dtype):
    """Safe sublane multiple for a block's second-minor dim (8/16/32 by packing)."""
    itemsize = jnp.dtype(dtype).itemsize
    return 8 * max(1, 4 // itemsize)


# ----------------------------- fused kernel (path A) --------------------------

def _fused_part_kernel(num_ref, ut_ref, v_ref, w_ref, o_ref):
    """One q/k part per grid step: sigma + reweight, weight read exactly once.

    num_ref : SMEM (2,)      f32   softplus(scale_i) + alpha, per part
    ut_ref  : VMEM (E, 2)          spectral-norm left vectors (transposed)
    v_ref   : VMEM (2, n)          spectral-norm right vectors
    w_ref   : VMEM (E, n)          weight part (q for step 0, k for step 1)
    o_ref   : VMEM (E, n)          output part (aliased with the weight buffer)
    """
    p = pl.program_id(0)                                   # 0 -> q, 1 -> k
    w32 = w_ref[...].astype(jnp.float32)                   # (E, n)
    u_col = jnp.where(p == 0, ut_ref[:, 0:1], ut_ref[:, 1:2]).astype(jnp.float32)  # (E, 1)
    v_row = jnp.where(p == 0, v_ref[0:1, :], v_ref[1:2, :]).astype(jnp.float32)    # (1, n)

    # sigma = u^T W v  (exact f32 on VPU/XLU; avoids MXU precision passes).
    wv = jnp.sum(w32 * v_row, axis=1, keepdims=True)       # (E, 1)
    sigma = jnp.sum(wv * u_col) + jnp.float32(_SN_EPS)     # scalar

    num = jnp.where(p == 0, num_ref[0], num_ref[1])        # softplus(s)+alpha
    scale = num / sigma
    o_ref[...] = (w32 * scale).astype(o_ref.dtype)


def _reweight_fused(weight, u, v, num, E, n):
    three_e = 3 * E
    u_t = u.astype(jnp.float32).T                          # (E, 2) tiny transpose
    v32 = v.astype(jnp.float32)                            # (2, n)
    return pl.pallas_call(
        _fused_part_kernel,
        out_shape=jax.ShapeDtypeStruct((three_e, n), weight.dtype),
        grid=(2,),
        in_specs=[
            pl.BlockSpec(memory_space=pltpu.MemorySpace.SMEM),   # num (2,)
            pl.BlockSpec((E, 2), lambda p: (0, 0)),              # u_t
            pl.BlockSpec((2, n), lambda p: (0, 0)),              # v
            pl.BlockSpec((E, n), lambda p: (p, 0)),              # weight part p
        ],
        out_specs=pl.BlockSpec((E, n), lambda p: (p, 0)),
        # The v-part (last third) is never visited by the grid; aliasing the
        # weight buffer to the output makes it pass through unchanged.
        input_output_aliases={3: 0},
        compiler_params=pltpu.CompilerParams(
            dimension_semantics=("parallel",),
            vmem_limit_bytes=48 * 1024 * 1024,
        ),
    )(num, u_t, v32, weight)


# --------------------------- streaming kernel (path B) ------------------------

def _scale_rows_kernel(scale_ref, w_ref, o_ref):
    """Element-wise scale of one lane-dense row tile.

    scale_ref : SMEM (2,)       f32 precomputed per-part scales (q, k)
    w_ref     : VMEM (bm, 128)  weight row tile (flattened view)
    o_ref     : VMEM (bm, 128)  output row tile (aliased with the input)
    """
    p = pl.program_id(0)
    s = jnp.where(p == 0, scale_ref[0], scale_ref[1])
    o_ref[...] = (w_ref[...].astype(jnp.float32) * s).astype(o_ref.dtype)


def _pick_block_rows(rows, mult, cap=4096):
    """Largest divisor of `rows` that is a multiple of `mult`, capped (~2 MiB)."""
    best = mult
    bm = mult
    limit = min(rows, cap)
    while bm <= limit:
        if rows % bm == 0:
            best = bm
        bm += mult
    return best


def _compute_scales(weight, u, v, scale_raw):
    """(2,) f32 scales: (softplus(s_i) + alpha) / (u_i^T W_i v_i + eps)."""
    E = weight.shape[0] // 3
    w32 = weight.astype(jnp.float32)
    u32 = u.astype(jnp.float32)
    v32 = v.astype(jnp.float32)
    sigma_q = u32[0] @ (w32[:E] @ v32[0]) + jnp.float32(_SN_EPS)
    sigma_k = u32[1] @ (w32[E:2 * E] @ v32[1]) + jnp.float32(_SN_EPS)
    num = jax.nn.softplus(scale_raw.astype(jnp.float32)) + jnp.float32(_ALPHA)
    return num / jnp.stack([sigma_q, sigma_k])


def _reweight_streaming(weight, scales, E, n):
    mult = _sublane_mult(weight.dtype)
    rows_per_part = (E * n) // _LANES
    total_rows = 3 * rows_per_part
    bm = _pick_block_rows(rows_per_part, mult)
    nblk = rows_per_part // bm

    w_flat = weight.reshape(total_rows, _LANES)            # lane-dense view

    out_flat = pl.pallas_call(
        _scale_rows_kernel,
        out_shape=jax.ShapeDtypeStruct((total_rows, _LANES), weight.dtype),
        grid=(2, nblk),
        in_specs=[
            pl.BlockSpec(memory_space=pltpu.MemorySpace.SMEM),            # scales
            pl.BlockSpec((bm, _LANES), lambda p, r: (p * nblk + r, 0)),   # weight
        ],
        out_specs=pl.BlockSpec((bm, _LANES), lambda p, r: (p * nblk + r, 0)),
        # Output buffer IS the weight buffer: the v-part (last third) is never
        # visited by the grid and therefore passes through unchanged.
        input_output_aliases={1: 0},
        compiler_params=pltpu.CompilerParams(
            dimension_semantics=("parallel", "parallel"),
            vmem_limit_bytes=32 * 1024 * 1024,
        ),
    )(scales, w_flat)

    return out_flat.reshape(3 * E, n)


# ----------------------------------- wrapper ----------------------------------

def attn_sn_reweight(weight, u, v, scale_raw, *, path="auto"):
    """weight: (3E, n); u: (2, E); v: (2, n); scale_raw: (2,) raw (pre-softplus)."""
    three_e, n = weight.shape
    assert three_e % 3 == 0
    E = three_e // 3
    assert u.shape == (2, E), u.shape
    assert v.shape == (2, n), v.shape
    assert scale_raw.shape == (2,), scale_raw.shape

    itemsize = jnp.dtype(weight.dtype).itemsize
    mult = _sublane_mult(weight.dtype)
    part_f32_bytes = E * n * 4
    fused_ok = (E % mult == 0) and (part_f32_bytes <= _FUSED_PART_F32_BYTES_MAX)
    streaming_ok = (E * n) % (mult * _LANES) == 0

    if path == "auto":
        path = "fused" if fused_ok else ("streaming" if streaming_ok else "jax")

    if path == "fused":
        assert fused_ok
        num = jax.nn.softplus(scale_raw.astype(jnp.float32)) + jnp.float32(_ALPHA)
        return _reweight_fused(weight, u, v, num, E, n)
    if path == "streaming":
        assert streaming_ok
        scales = _compute_scales(weight, u, v, scale_raw)
        return _reweight_streaming(weight, scales, E, n)

    # TODO(synk): no Pallas tiling path for E not sublane-aligned AND E*n not a
    # multiple of (sublane*128); fall back to the plain-JAX reference there.
    return attn_sn_reweight_ref(weight, u, v, scale_raw)


# ----------------------- parameter setup (plain JAX glue) ---------------------

def _normalize(x, eps):
    return x / jnp.maximum(jnp.linalg.norm(x), eps)


def _init_sn_vectors(w_mat, key, n_iters=15, eps=_SN_EPS):
    """Mimic torch _SpectralNorm.__init__: random normalized u/v + power iters."""
    m, n = w_mat.shape
    ku, kv = jax.random.split(key)
    u = _normalize(jax.random.normal(ku, (m,), jnp.float32), eps)
    v = _normalize(jax.random.normal(kv, (n,), jnp.float32), eps)
    for _ in range(n_iters):
        u = _normalize(w_mat @ v, eps)
        v = _normalize(w_mat.T @ u, eps)
    return u, v


def _init_scale_raw():
    # init_norm_to_current=False -> init_scale = 1.0; version 2:
    t = max(1.0 - _ALPHA, _INIT_EPS)
    return math.log(math.exp(t) - 1.0)


# ----------------------------- pure-JAX reference -----------------------------

def attn_sn_reweight_ref(weight, u, v, scale_raw):
    E = weight.shape[0] // 3
    outs = []
    for i in range(2):
        w = weight[i * E:(i + 1) * E].astype(jnp.float32)
        sigma = u[i].astype(jnp.float32) @ (w @ v[i].astype(jnp.float32)) + _SN_EPS
        sc = (jax.nn.softplus(scale_raw[i].astype(jnp.float32)) + _ALPHA) / sigma
        outs.append((w * sc).astype(weight.dtype))
    outs.append(weight[2 * E:])
    return jnp.concatenate(outs, axis=0)


if __name__ == "__main__":
    key = jax.random.PRNGKey(0)
    jit_fn = jax.jit(attn_sn_reweight, static_argnames=("path",))

    def run_case(E, n, path):
        kk = jax.random.fold_in(key, E * 1000 + n)
        k_w, k_u0, k_u1 = jax.random.split(kk, 3)
        weight = jax.random.normal(k_w, (3 * E, n), jnp.float32) * 0.02
        # u/v spectral-norm buffers for parts 0 and 1 (part 2 is nn.Identity).
        u0, v0 = _init_sn_vectors(weight[0:E], k_u0)
        u1, v1 = _init_sn_vectors(weight[E:2 * E], k_u1)
        u = jnp.stack([u0, u1], axis=0)                    # (2, E)
        v = jnp.stack([v0, v1], axis=0)                    # (2, n)
        s0 = _init_scale_raw()
        scale_raw = jnp.array([s0, s0], jnp.float32)       # (2,)

        out = jax.block_until_ready(jit_fn(weight, u, v, scale_raw, path=path))
        ref = attn_sn_reweight_ref(weight, u, v, scale_raw)
        assert out.shape == weight.shape and out.dtype == weight.dtype
        err = float(jnp.max(jnp.abs(out - ref)))
        assert jnp.allclose(out, ref, atol=1e-5, rtol=1e-5), \
            f"{path} path max err {err}"

    run_case(32, 32, "fused")        # small attention qkv: weight (96, 32)
    run_case(64, 128, "streaming")   # exercises the large-weight streaming path
    print("KERNEL_OK")
</pallas_src>

<mosaic_0001>
module attributes {stable_mosaic.version = 11 : i64} {
  func.func @_fused_part_kernel(%arg0: i32, %arg1: memref<2xf32, #tpu.memory_space<smem>>, %arg2: memref<32x2xf32, #tpu.memory_space<vmem>>, %arg3: memref<2x32xf32, #tpu.memory_space<vmem>>, %arg4: memref<32x32xf32, #tpu.memory_space<vmem>>, %arg5: memref<32x32xf32, #tpu.memory_space<vmem>>) attributes {dimension_semantics = [#tpu.dimension_semantics<parallel>], iteration_bounds = array<i64: 2>, scalar_prefetch = 0 : i64, scratch_operands = 0 : i64, tpu.core_type = #tpu.core_type<tc>, window_params = [{transform_indices = @transform_0, window_bounds = array<i64: 2>}, {pipeline_mode = #tpu.pipeline_mode<synchronous>, transform_indices = @transform_1, window_bounds = array<i64: 32, 2>}, {pipeline_mode = #tpu.pipeline_mode<synchronous>, transform_indices = @transform_2, window_bounds = array<i64: 2, 32>}, {transform_indices = @transform_3, window_bounds = array<i64: 32, 32>}, {transform_indices = @transform_4, window_bounds = array<i64: 32, 32>}]} {
    %c0 = arith.constant 0 : index
    %c0_0 = arith.constant 0 : index
    %0 = vector.load %arg4[%c0, %c0_0] : memref<32x32xf32, #tpu.memory_space<vmem>>, vector<32x32xf32>
    %c0_i32 = arith.constant 0 : i32
    %1 = arith.cmpi eq, %arg0, %c0_i32 : i32
    %c0_1 = arith.constant 0 : index
    %c0_2 = arith.constant 0 : index
    %2 = vector.load %arg2[%c0_1, %c0_2] : memref<32x2xf32, #tpu.memory_space<vmem>>, vector<32x1xf32>
    %c0_3 = arith.constant 0 : index
    %c1 = arith.constant 1 : index
    %3 = vector.load %arg2[%c0_3, %c1] : memref<32x2xf32, #tpu.memory_space<vmem>>, vector<32x1xf32>
    %4 = arith.select %1, %2, %3 : vector<32x1xf32>
    %c0_i32_4 = arith.constant 0 : i32
    %5 = arith.cmpi eq, %arg0, %c0_i32_4 : i32
    %c0_5 = arith.constant 0 : index
    %c0_6 = arith.constant 0 : index
    %6 = vector.load %arg3[%c0_5, %c0_6] : memref<2x32xf32, #tpu.memory_space<vmem>>, vector<1x32xf32>
    %c1_7 = arith.constant 1 : index
    %c0_8 = arith.constant 0 : index
    %7 = vector.load %arg3[%c1_7, %c0_8] : memref<2x32xf32, #tpu.memory_space<vmem>>, vector<1x32xf32>
    %8 = arith.select %5, %6, %7 : vector<1x32xf32>
    %9 = vector.broadcast %8 : vector<1x32xf32> to vector<32x32xf32>
    %10 = arith.mulf %0, %9 : vector<32x32xf32>
    %cst = arith.constant dense<0.000000e+00> : vector<32xf32>
    %11 = vector.multi_reduction <add>, %10, %cst [1] : vector<32x32xf32> to vector<32xf32>
    %12 = vector.shape_cast %11 : vector<32xf32> to vector<32x1xf32>
    %13 = arith.mulf %12, %4 : vector<32x1xf32>
    %14 = vector.shape_cast %13 : vector<32x1xf32> to vector<1x32x1xf32>
    %cst_9 = arith.constant dense<0.000000e+00> : vector<1xf32>
    %15 = vector.multi_reduction <add>, %14, %cst_9 [1, 2] : vector<1x32x1xf32> to vector<1xf32>
    %16 = vector.shape_cast %15 : vector<1xf32> to vector<1x1x1xf32>
    %17 = vector.extract %16[0, 0, 0] : f32 from vector<1x1x1xf32>
    %cst_10 = arith.constant 9.99999996E-13 : f32
    %18 = arith.addf %17, %cst_10 : f32
    %c0_i32_11 = arith.constant 0 : i32
    %19 = arith.cmpi eq, %arg0, %c0_i32_11 : i32
    %c0_12 = arith.constant 0 : index
    %20 = memref.load %arg1[%c0_12] : memref<2xf32, #tpu.memory_space<smem>>
    %c1_13 = arith.constant 1 : index
    %21 = memref.load %arg1[%c1_13] : memref<2xf32, #tpu.memory_space<smem>>
    %22 = arith.select %19, %20, %21 : f32
    %23 = arith.divf %22, %18 : f32
    %24 = vector.broadcast %23 : f32 to vector<32x32xf32>
    %25 = arith.mulf %0, %24 : vector<32x32xf32>
    %c0_14 = arith.constant 0 : index
    %c0_15 = arith.constant 0 : index
    %26 = vector.load %arg5[%c0_14, %c0_15] : memref<32x32xf32, #tpu.memory_space<vmem>>, vector<32x32xf32>
    tpu.vector_store %arg5[%c0_14, %c0_15], %25 {strides = array<i32>} : memref<32x32xf32, #tpu.memory_space<vmem>>, vector<32x32xf32>,
    return
  }
  func.func @transform_0(%arg0: i32) -> i32 {
    %c0_i32 = arith.constant 0 : i32
    %c0_i32_0 = arith.constant 0 : i32
    return %c0_i32 : i32
  }
  func.func @transform_1(%arg0: i32) -> (i32, i32) {
    %c0_i32 = arith.constant 0 : i32
    %c0_i32_0 = arith.constant 0 : i32
    %c0_i32_1 = arith.constant 0 : i32
    return %c0_i32, %c0_i32_0 : i32, i32
  }
  func.func @transform_2(%arg0: i32) -> (i32, i32) {
    %c0_i32 = arith.constant 0 : i32
    %c0_i32_0 = arith.constant 0 : i32
    %c0_i32_1 = arith.constant 0 : i32
    return %c0_i32, %c0_i32_0 : i32, i32
  }
  func.func @transform_3(%arg0: i32) -> (i32, i32) {
    %c0_i32 = arith.constant 0 : i32
    %c0_i32_0 = arith.constant 0 : i32
    return %arg0, %c0_i32 : i32, i32
  }
  func.func @transform_4(%arg0: i32) -> (i32, i32) {
    %c0_i32 = arith.constant 0 : i32
    %c0_i32_0 = arith.constant 0 : i32
    return %arg0, %c0_i32 : i32, i32
  }
}

</mosaic_0001>

<bundles_post_ra>
// kernel: attn_sn_reweight.1
= control target key start
LH: loop header
LB: loop body
LE: loop exit
PB: predicated region body
PF: predicated region fallthrough
CT: control target
= control target key end

     0   :  { %9 = vsyncpa [#allocation3], 0  ;;  %s481_s15 = smov 0   ;;  %s569_s0 = inlined_call_operand.vmem [shape: f32[2], index: 0, kind: input, shape index: {}]   ;;  %s570_s1 = inlined_call_operand.vmem [shape: f32[32,2], index: 1, kind: input, shape index: {}]   ;;  %s571_s2 = inlined_call_operand.vmem [shape: f32[2,32], index: 2, kind: input, shape index: {}]   ;;  %s572_s3 = inlined_call_operand.vmem [shape: f32[96,32], index: 3, kind: input, shape index: {}, may-alias: {3,4}]   ;;  %s573_s4 = inlined_call_operand.vmem [shape: f32[96,32], index: 4, kind: output, shape index: {}, may-alias: {3,4}]  }
   0x1 LB: > { %s387_s16 = sadd.s32 4294967295, %s452_s15   ;;  %p389_p0 = scmp.ge.s32.totalorder %s452_s15, 1  ;;  %s452_s15 = sphi %s481_s15, %s15_s15  }
   0x2   : > { %p135_p1 = scmp.lt.s32.totalorder %s452_s15, 3  ;;  %s147_s19 = sshll.u32 %s569_s0, 4  ;;  %s148_s19 = int_to_ptr.vmem [resolvable:$true] %s147_s19 }
   0x3   : > { %p492_p3 = scmp.eq.s32.totalorder %s387_s16, 0  ;;  %s454_s21 = smov [#allocation2]  }
   0x4   : > { %p136_p2 = pnand %p389_p0, %p135_p1 }
   0x6   : > { %p409_p4 = pneg %p136_p2  ;;  %175 = sbr.rel (%p136_p2) target bundleno = 436 (0x1b4), region = 36 }
   0x8   : > { %p410_p5 = pnand %p492_p3, %p409_p4 }
   0xa   : > { %412 = dma.vmem_to_smem (!%p410_p5), %s148_s19, 16, %s454_s21, [#allocation3]  }
   0xb   : > { %447 = dma.done.wait (%p492_p3), [#allocation3], 16  }
   0xc   : > { %449 = vsyncadd (%p492_p3), [#allocation3], 4294967280 }
   0xd   : > { %182 = sfence }
   0xe   : > { %v222_v0 = vld [vmem:[%s570_s1 + $0x10] sm:$0xff]  ;;  %v220_v1 = vld [vmem:[%s570_s1] sm:$0xff]  ;;  %s394_s26 = sshll.u32 %s387_s16, 2  ;;  %s455_s27 = smov 127   ;;  %v221_v6 = vld [vmem:[%s570_s1 + $0x8] sm:$0xff]  ;;  %vm255_vm1 = vcmask 261120  }
   0xf   : > { %235 = vrot.lane.b32.xlu2 %v222_v0, %s455_s27  ;;  %231 = vrot.lane.b32.xlu0 %v220_v1, %s455_s27  ;;  %p204_p6 = scmp.lt.s32.totalorder %s394_s26, 11  ;;  %v247_v2 = vld [vmem:[%s571_s2] sm:$0x1]  ;;  %v248_v3 = vld [vmem:[%s571_s2 + $0x1] sm:$0x1]  ;;  %vm272_vm2 = vcmask 7168  }
  0x10   : > { %s224_s28 = scalar_select %p492_p3, 1, 0  ;;  %v223_v13 = vld [vmem:[%s570_s1 + $0x18] sm:$0xff] }
  0x11   : > { %s576_s26 = smov (!%p204_p6, %s394_s26), 11  ;;  %s290_s18 = sld [smem:[#allocation2]] }
  0x12   : > { %v225_v4 = vstv %s224_s28  ;;  %s395_s7 = sshll.u32 %s576_s26, 3  ;;  %s398_s19 = sld [smem:[#allocation2 + $0x1]] }
  0x13   : > { %vm226_vm0 = vcmp.eq.s32.totalorder %v225_v4, 1  ;;  %s207_s10 = scalar_lea.vmem %s572_s3, %s395_s7  ;;  %s213_s25 = scalar_lea.vmem %s573_s4, %s395_s7 }
  0x14   : > { %v249_v5 = vsel %vm226_vm0, %v247_v2, %v248_v3  ;;  %v528_v7 = vld [vmem:[%s207_s10] sm:$0xff]  ;;  %v531_v10 = vld [vmem:[%s207_s10 + $0x8] sm:$0xff]  ;;  %v539_v15 = vld [vmem:[%s207_s10 + $0x18] sm:$0xff] }
  0x15   : > { %v250_v8 = vperm.slane %v249_v5, 0  ;;  %v543_v18 = vld [vmem:[%s207_s10 + $0x10] sm:$0xff] }
  0x17   : > { %v251_v9 = vmul.f32 %v250_v8, %v528_v7  ;;  %233 = vrot.lane.b32.xlu0 %v221_v6, %s455_s27  ;;  %v252_v12 = vmul.f32 %v250_v8, %v531_v10  ;;  %v254_v16 = vmul.f32 %v250_v8, %v539_v15  ;;  %v253_v19 = vmul.f32 %v250_v8, %v543_v18 }
  0x18   : > { %s578_s18 = smov (!%p492_p3, %s290_s18), %s398_s19 }
  0x19   : > { %v256_v11 = vsel %vm255_vm1, %v251_v9, 0.0  ;;  %v259_v14 = vsel %vm255_vm1, %v252_v12, 0.0  ;;  %v265_v17 = vsel %vm255_vm1, %v254_v16, 0.0  ;;  %v262_v20 = vsel %vm255_vm1, %v253_v19, 0.0 }
  0x1a   : > { %257 = vadd.xlane.f32.xlu1 %v256_v11 }
  0x1f   : > { %237 = vrot.lane.b32.xlu0 %v223_v13, %s455_s27 }
  0x22   : > { %260 = vadd.xlane.f32.xlu1 %v259_v14 }
  0x2a   : > { %266 = vadd.xlane.f32.xlu1 %v265_v17 }
  0x38   : > { %263 = vadd.xlane.f32.xlu2 %v262_v20 }
  0x69   : > { %v236_v25 = vpop.permute.xlu2 %235 }
  0x6a   : > { %v245_v36 = vsel %vm226_vm0, %v222_v0, %v236_v25 }
  0x81   : > { %v232_v21 = vpop.permute.xlu0 %231 }
  0x82   : > { %v243_v26 = vsel %vm226_vm0, %v220_v1, %v232_v21 }
  0x89   : > { %v234_v23 = vpop.permute.xlu0 %233 }
  0x8a   : > { %v244_v27 = vsel %vm226_vm0, %v221_v6, %v234_v23 }
  0x8d   : > { %v258_v22 = vpop.xlane.xlu1 %257 }
  0x8e   : > { %v268_v29 = vmul.f32 %v258_v22, %v243_v26 }
  0x90   : > { %v273_v33 = vsel %vm272_vm2, %v268_v29, 0.0 }
  0x91   : > { %v238_v28 = vpop.permute.xlu0 %237 }
  0x92   : > { %v246_v31 = vsel %vm226_vm0, %v223_v13, %v238_v28 }
  0x95   : > { %v261_v24 = vpop.xlane.xlu1 %260 }
  0x96   : > { %v269_v30 = vmul.f32 %v261_v24, %v244_v27 }
  0x98   : > { %v274_v34 = vsel %vm272_vm2, %v269_v30, 0.0 }
  0x99   : > { %v275_v39 = vadd.f32 %v274_v34, %v273_v33 }
  0x9d   : > { %v267_v32 = vpop.xlane.xlu1 %266 }
  0x9e   : > { %v271_v35 = vmul.f32 %v267_v32, %v246_v31 }
  0xa0   : > { %v278_v41 = vsel %vm272_vm2, %v271_v35, 0.0 }
  0xab   : > { %v264_v37 = vpop.xlane.xlu2 %263 }
  0xac   : > { %v270_v38 = vmul.f32 %v264_v37, %v245_v36 }
  0xae   : > { %v276_v40 = vsel %vm272_vm2, %v270_v38, 0.0 }
  0xaf   : > { %v277_v42 = vadd.f32 %v276_v40, %v275_v39 }
  0xb1   : > { %v279_v43 = vadd.f32 %v278_v41, %v277_v42 }
  0xb3   : > { %280 = vadd.xlane.f32.xlu0 %v279_v43 }
 0x126   : > { %v281_v44 = vpop.xlane.xlu0 %280 }
 0x127   : > { %v282_v45 = vrot.slane %v281_v44, 4 }
 0x129   : > { %v283_v46 = vadd.f32 %v282_v45, %v281_v44 }
 0x12b   : > { %v284_v47 = vrot.slane %v283_v46, 2 }
 0x12d   : > { %v285_v48 = vadd.f32 %v284_v47, %v283_v46 }
 0x12f   : > { %v286_v49 = vrot.slane %v285_v48, 1 }
 0x131   : > { %v287_v50 = vadd.f32 %v286_v49, %v285_v48 }
 0x133   : > { %401 = vpush %v287_v50 }
 0x164   : > { %s402_s16 = spop %401 }
 0x165   : > { %s289_s17 = sadd.f32 1e-12, %s402_s16 }
 0x167   : > { %v293_v51 = vstv %s289_s17 }
 0x168   : > { %425 = vrcp.f32 %v293_v51  ;;  %v305_v55 = vand.u32 2147483648, %v293_v51  ;;  %v303_v57 = vand.u32 2147483647, %v293_v51  ;;  %vm299_vm4 = vweird.f32 %v293_v51 }
 0x16a   : > { %v306_v59 = vor.u32 1.1754944e-38, %v305_v55  ;;  %vm304_vm6 = vcmp.eq.f32.partialorder %v303_v57, 8.507059e+37 }
 0x16e   : > { %v426_v52 = vpop.eup %425 }
 0x16f   : > { %v295_v53 = vmul.f32 %v426_v52, %v293_v51  ;;  %vm300_vm3 = vweird.f32 %v426_v52 }
 0x170   : > { %vm301_vm5 = vmor %vm299_vm4, %vm300_vm3 }
 0x171   : > { %v296_v54 = vsub.f32 1.0, %v295_v53 }
 0x173   : > { %v297_v56 = vmul.f32 %v426_v52, %v296_v54 }
 0x175   : > { %v298_v58 = vadd.f32 %v426_v52, %v297_v56 }
 0x177   : > { %v302_v60 = vsel %vm301_vm5, %v426_v52, %v298_v58 }
 0x178   : > { %v307_v61 = vsel %vm304_vm6, %v306_v59, %v302_v60 }
 0x179   : > { %403 = vpush %v307_v61 }
 0x1aa   : > { %s404_s21 = spop %403 }
 0x1ab   : > { %s309_s22 = smul.f32 %s404_s21, %s578_s18 }
 0x1ad   : > { %v310_v62 = vstv %s309_s22 }
 0x1ae   : > { %v311_v63 = vmul.f32 %v310_v62, %v528_v7  ;;  %v312_v0 = vmul.f32 %v310_v62, %v531_v10  ;;  %v313_v1 = vmul.f32 %v310_v62, %v543_v18  ;;  %v314_v2 = vmul.f32 %v310_v62, %v539_v15 }
 0x1b0   : > { %315 = vst.msk [vmem:[%s213_s25] sm:$0xff] %vm255_vm1, %v311_v63 }
 0x1b1   : > { %316 = vst.msk [vmem:[%s213_s25 + $0x8] sm:$0xff] %vm255_vm1, %v312_v0 }
 0x1b2   : > { %317 = vst.msk [vmem:[%s213_s25 + $0x10] sm:$0xff] %vm255_vm1, %v313_v1 }
 0x1b3   : > { %318 = vst.msk [vmem:[%s213_s25 + $0x18] sm:$0xff] %vm255_vm1, %v314_v2 }
 0x1b4 PF: > { %s15_s15 = sadd.s32 1, %s452_s15  }
 0x1b5   : > { %p12_p7 = scmp.ge.s32.totalorder %s15_s15, 4  }
 0x1b7   :  { %14 = sbr.rel (!%p12_p7) target bundleno = 1 (0x1), region = 71 }
 0x1bc   :  { %341 = vsyncpa [#allocation3], 1 }
 0x1bd   :  { %343 = vsyncpa [#allocation3 + $0x1], 1 }

</bundles_post_ra>
